<compile_context>
chip_gen: v7x
topology: tpu7x:2x2x1
jax: 0.10.0
libtpu: 0.0.40
codegen_flags: <defaults>
</compile_context>

<pallas_src>
import math

import jax
import jax.numpy as jnp
import numpy as np
from jax.experimental import pallas as pl
from jax.experimental.pallas import tpu as pltpu

KS = 7    # kernel_size
PAD = 3   # padding for kernel_size == 7


def _round_up(n, m):
    return ((n + m - 1) // m) * m


def sa_enhance_kernel(x_ref, phase_ref, t_ref, o_ref, mpad_ref):
    """One grid step processes `bt` whole images.

    x_ref    : (bt, C, H, W)        input block (VMEM)
    phase_ref: (bt*H, W)   f32      row-within-image index (same every block)
    t_ref    : (KS, W, Wn) f32      banded Toeplitz matrices (weights folded)
    o_ref    : (bt*H, W)            output block (row-stacked images)
    mpad_ref : (bt*H+2*PAD, W) f32  scratch: row-stacked channel-max maps with
                                    PAD slack rows top/bottom.  Never zeroed:
                                    every read into pad / foreign-image rows is
                                    masked out below.
    """
    bt, C, H, W = x_ref.shape
    R = bt * H
    Wn = t_ref.shape[2]

    # ---- 1) streaming channel max; cast to f32 only AFTER the max ---------
    if C <= 64:
        m = x_ref[:, 0, :, :]
        for c in range(1, C):
            m = jnp.maximum(m, x_ref[:, c, :, :])
    else:
        m = jax.lax.fori_loop(
            1, C, lambda c, acc: jnp.maximum(acc, x_ref[:, c, :, :]),
            x_ref[:, 0, :, :])
    m = m.astype(jnp.float32)                                    # (bt, H, W)

    # ---- 2) stack the per-image max maps into the scratch -----------------
    for b in range(bt):
        mpad_ref[PAD + b * H:PAD + (b + 1) * H, :] = m[b]

    # ---- 3) 7x7 conv as 7 banded (Toeplitz) matmuls on the MXU ------------
    # Row-chunked so live values stay within the vreg budget.
    rc_max = 128 if Wn <= 128 else max(8, ((128 * 128) // Wn) // 8 * 8)
    r0 = 0
    while r0 < R:                                   # static (unrolled) loop
        rc = min(rc_max, R - r0)
        ph = phase_ref[r0:r0 + rc, :]               # (rc, W) row-in-image idx
        acc = None
        for kh in range(KS):
            # scratch row (r + kh) holds image row (i + kh - PAD) of r's image
            strip = mpad_ref[r0 + kh:r0 + kh + rc, :]            # (rc, W)
            inside = jnp.logical_and(ph + kh >= PAD, ph + kh < PAD + H)
            # select (not multiply): masks pad rows, neighbouring images and
            # any NaN garbage from the ragged last grid block.
            lhs = jnp.where(inside, strip, 0.0)
            d = jnp.dot(lhs, t_ref[kh],
                        preferred_element_type=jnp.float32,
                        precision=jax.lax.Precision.HIGHEST)
            acc = d if acc is None else acc + d
        # jax.nn.sigmoid lowers to the logistic (EUP exp/tanh path), keeping
        # the epilogue off the VALU; exact enough for tight tolerances.
        o_ref[r0:r0 + rc, :] = jax.nn.sigmoid(acc[:, :W]).astype(o_ref.dtype)
        r0 += rc


def _build_toeplitz(weight2d, W, Wn):
    """T[kh, q, w] = weight[kh, q + PAD - w] inside the band, else 0.

    Folds the conv's W-direction zero padding into the band, so the scratch
    needs no padding columns; columns W..Wn-1 are zero (lane padding so the
    MXU N dim is a full multiple of 128).
    """
    q = np.arange(W)[:, None]
    w = np.arange(W)[None, :]
    kw = q + PAD - w                                             # (W, W)
    valid = jnp.asarray((kw >= 0) & (kw < KS))
    kw_c = np.clip(kw, 0, KS - 1)
    w2 = weight2d.astype(jnp.float32)                            # (KS, KS)
    t = jnp.where(valid[None], w2[:, kw_c], 0.0)                 # (KS, W, W)
    return jnp.pad(t, ((0, 0), (0, 0), (0, Wn - W)))             # (KS, W, Wn)


def sa_enhance(x, weight2d):
    """x: (B, C, H, W); weight2d: (KS, KS) float32 -> (B, 1, H, W)."""
    B, C, H, W = x.shape
    isz = x.dtype.itemsize
    sub = max(8, 32 // isz)                 # sublane tile for this dtype
    lanes = _round_up(W, 128)               # lane-padded last dim in VMEM
    Wn = _round_up(W, 128)                  # matmul N dim (>=128)

    # --- VMEM budget derived from the chip (v7x: 64 MiB/TC, not 128) -------
    try:
        vmem_cap = int(getattr(pltpu.get_tpu_info(), "vmem_capacity_bytes",
                               64 * 1024 * 1024))
    except Exception:
        vmem_cap = 64 * 1024 * 1024
    budget = min(int(vmem_cap * 0.40), 40 * 1024 * 1024)

    t_bytes = 2 * KS * _round_up(W, 8) * Wn * 4

    def footprint(bt):                      # VMEM bytes incl. (8,128) padding
        r = bt * H
        in_b = 2 * bt * C * _round_up(H, sub) * lanes * isz      # dbl-buffered
        out_b = 2 * _round_up(r, sub) * lanes * isz
        scr_b = _round_up(r + 2 * PAD, 8) * lanes * 4
        ph_b = 2 * _round_up(r, 8) * lanes * 4
        return in_b + out_b + scr_b + ph_b + t_bytes

    # Largest bt under the budget (row cap bounds scratch / unroll size).
    R_MAX = 2048
    bt = max(1, min(B, 256, R_MAX // max(1, H)))
    while bt > 1 and footprint(bt) > budget:
        bt -= 1
    # Megacore (v7x has 2 TCs): keep at least 2 grid steps when B allows it.
    if B > 1:
        bt = min(bt, pl.cdiv(B, 2))
    # Output block rows must be a multiple of 8 unless the block is full-size.
    if bt < B:
        while bt > 1 and (bt * H) % 8 != 0:
            bt -= 1
        if (bt * H) % 8 != 0:
            bt = min(B, 8 // math.gcd(H, 8))
    bt = max(1, bt)
    grid = pl.cdiv(B, bt)                   # ragged last block handled by Pallas
    R = bt * H
    vmem_limit = int(min(vmem_cap * 0.8, footprint(bt) + (16 << 20)))

    phase_rows = np.tile(np.arange(H, dtype=np.float32), bt)           # (R,)
    phase = jnp.asarray(np.repeat(phase_rows[:, None], W, axis=1))     # (R, W)
    t = _build_toeplitz(weight2d, W, Wn)                               # (KS,W,Wn)

    out2d = pl.pallas_call(
        sa_enhance_kernel,
        out_shape=jax.ShapeDtypeStruct((B * H, W), x.dtype),
        grid_spec=pltpu.PrefetchScalarGridSpec(
            num_scalar_prefetch=0,
            grid=(grid,),
            in_specs=[
                pl.BlockSpec((bt, C, H, W), lambda b: (b, 0, 0, 0)),
                pl.BlockSpec((R, W), lambda b: (0, 0)),          # fetched once
                pl.BlockSpec((KS, W, Wn), lambda b: (0, 0, 0)),  # fetched once
            ],
            out_specs=pl.BlockSpec((R, W), lambda b: (b, 0)),
            scratch_shapes=[pltpu.VMEM((R + 2 * PAD, W), jnp.float32)],
        ),
        compiler_params=pltpu.CompilerParams(
            dimension_semantics=("parallel",),
            vmem_limit_bytes=vmem_limit,
        ),
    )(x, phase, t)

    # (B*H, W) and (B, 1, H, W) share the same row-major layout: free reshape.
    return out2d.reshape(B, 1, H, W)


def reference(x, weight2d):
    max_out = jnp.max(x, axis=1, keepdims=True)                  # (B,1,H,W)
    w = weight2d.reshape(1, 1, KS, KS).astype(jnp.float32)
    y = jax.lax.conv_general_dilated(
        max_out.astype(jnp.float32), w, window_strides=(1, 1),
        padding=((PAD, PAD), (PAD, PAD)),
        dimension_numbers=("NCHW", "OIHW", "NCHW"),
        precision=jax.lax.Precision.HIGHEST)
    return jax.nn.sigmoid(y).astype(x.dtype)


if __name__ == "__main__":
    key = jax.random.PRNGKey(0)
    kx, kw_key, kx2 = jax.random.split(key, 3)

    # Conv2d(1, 1, 7, bias=False): PyTorch kaiming-uniform default init,
    # fan_in = 49 -> U(-1/7, 1/7).
    bound = 1.0 / np.sqrt(KS * KS)
    weight2d = jax.random.uniform(kw_key, (KS, KS), jnp.float32, -bound, bound)

    # Main case (shapes implied by the module: small NCHW feature map).
    B, C, H, W = 2, 4, 16, 16
    x = jax.random.normal(kx, (B, C, H, W), dtype=jnp.float32)
    out = jax.block_until_ready(sa_enhance(x, weight2d))
    ref = jax.block_until_ready(reference(x, weight2d))
    assert out.shape == (B, 1, H, W)
    np.testing.assert_allclose(np.asarray(out), np.asarray(ref),
                               rtol=1e-4, atol=1e-5)

    # Ragged-grid case: B=3 with bt=2 exercises the cdiv grid (discarded
    # padding block) and the inter-image row masking.
    B2, C2 = 3, 5
    x2 = jax.random.normal(kx2, (B2, C2, H, W), dtype=jnp.float32)
    out2 = jax.block_until_ready(sa_enhance(x2, weight2d))
    ref2 = jax.block_until_ready(reference(x2, weight2d))
    assert out2.shape == (B2, 1, H, W)
    np.testing.assert_allclose(np.asarray(out2), np.asarray(ref2),
                               rtol=1e-4, atol=1e-5)

    print("KERNEL_OK")
</pallas_src>

<mosaic_0001>
module attributes {stable_mosaic.version = 11 : i64} {
  func.func @sa_enhance_kernel(%arg0: i32, %arg1: memref<1x4x16x16xf32, #tpu.memory_space<vmem>>, %arg2: memref<16x16xf32, #tpu.memory_space<vmem>>, %arg3: memref<7x16x128xf32, #tpu.memory_space<vmem>>, %arg4: memref<16x16xf32, #tpu.memory_space<vmem>>, %arg5: memref<22x16xf32, #tpu.memory_space<vmem>>) attributes {dimension_semantics = [#tpu.dimension_semantics<parallel>], iteration_bounds = array<i64: 2>, scalar_prefetch = 0 : i64, scratch_operands = 1 : i64, tpu.core_type = #tpu.core_type<tc>, window_params = [{transform_indices = @transform_0, window_bounds = array<i64: 1, 4, 16, 16>}, {pipeline_mode = #tpu.pipeline_mode<synchronous>, transform_indices = @transform_1, window_bounds = array<i64: 16, 16>}, {pipeline_mode = #tpu.pipeline_mode<synchronous>, transform_indices = @transform_2, window_bounds = array<i64: 7, 16, 128>}, {transform_indices = @transform_3, window_bounds = array<i64: 16, 16>}]} {
    %c0 = arith.constant 0 : index
    %c0_0 = arith.constant 0 : index
    %c0_1 = arith.constant 0 : index
    %c0_2 = arith.constant 0 : index
    %0 = vector.load %arg1[%c0, %c0_0, %c0_1, %c0_2] : memref<1x4x16x16xf32, #tpu.memory_space<vmem>>, vector<1x1x16x16xf32>
    %1 = vector.shape_cast %0 : vector<1x1x16x16xf32> to vector<1x16x16xf32>
    %c0_3 = arith.constant 0 : index
    %c1 = arith.constant 1 : index
    %c0_4 = arith.constant 0 : index
    %c0_5 = arith.constant 0 : index
    %2 = vector.load %arg1[%c0_3, %c1, %c0_4, %c0_5] : memref<1x4x16x16xf32, #tpu.memory_space<vmem>>, vector<1x1x16x16xf32>
    %3 = vector.shape_cast %2 : vector<1x1x16x16xf32> to vector<1x16x16xf32>
    %4 = arith.maximumf %1, %3 : vector<1x16x16xf32>
    %c0_6 = arith.constant 0 : index
    %c2 = arith.constant 2 : index
    %c0_7 = arith.constant 0 : index
    %c0_8 = arith.constant 0 : index
    %5 = vector.load %arg1[%c0_6, %c2, %c0_7, %c0_8] : memref<1x4x16x16xf32, #tpu.memory_space<vmem>>, vector<1x1x16x16xf32>
    %6 = vector.shape_cast %5 : vector<1x1x16x16xf32> to vector<1x16x16xf32>
    %7 = arith.maximumf %4, %6 : vector<1x16x16xf32>
    %c0_9 = arith.constant 0 : index
    %c3 = arith.constant 3 : index
    %c0_10 = arith.constant 0 : index
    %c0_11 = arith.constant 0 : index
    %8 = vector.load %arg1[%c0_9, %c3, %c0_10, %c0_11] : memref<1x4x16x16xf32, #tpu.memory_space<vmem>>, vector<1x1x16x16xf32>
    %9 = vector.shape_cast %8 : vector<1x1x16x16xf32> to vector<1x16x16xf32>
    %10 = arith.maximumf %7, %9 : vector<1x16x16xf32>
    %11 = vector.shape_cast %10 : vector<1x16x16xf32> to vector<16x16xf32>
    %c3_12 = arith.constant 3 : index
    %c0_13 = arith.constant 0 : index
    %12 = vector.load %arg5[%c3_12, %c0_13] : memref<22x16xf32, #tpu.memory_space<vmem>>, vector<16x16xf32>
    tpu.vector_store %arg5[%c3_12, %c0_13], %11 {strides = array<i32>} : memref<22x16xf32, #tpu.memory_space<vmem>>, vector<16x16xf32>,
    %c0_14 = arith.constant 0 : index
    %c0_15 = arith.constant 0 : index
    %13 = vector.load %arg2[%c0_14, %c0_15] : memref<16x16xf32, #tpu.memory_space<vmem>>, vector<16x16xf32>
    %c0_16 = arith.constant 0 : index
    %c0_17 = arith.constant 0 : index
    %14 = vector.load %arg5[%c0_16, %c0_17] : memref<22x16xf32, #tpu.memory_space<vmem>>, vector<16x16xf32>
    %cst = arith.constant 0.000000e+00 : f32
    %15 = vector.broadcast %cst : f32 to vector<16x16xf32>
    %16 = arith.addf %13, %15 : vector<16x16xf32>
    %cst_18 = arith.constant 3.000000e+00 : f32
    %17 = vector.broadcast %cst_18 : f32 to vector<16x16xf32>
    %18 = arith.cmpf oge, %16, %17 : vector<16x16xf32>
    %cst_19 = arith.constant 0.000000e+00 : f32
    %19 = vector.broadcast %cst_19 : f32 to vector<16x16xf32>
    %20 = arith.addf %13, %19 : vector<16x16xf32>
    %cst_20 = arith.constant 1.900000e+01 : f32
    %21 = vector.broadcast %cst_20 : f32 to vector<16x16xf32>
    %22 = arith.cmpf olt, %20, %21 : vector<16x16xf32>
    %23 = arith.andi %18, %22 : vector<16x16xi1>
    %cst_21 = arith.constant 0.000000e+00 : f32
    %24 = vector.broadcast %cst_21 : f32 to vector<16x16xf32>
    %25 = arith.select %23, %14, %24 : vector<16x16xi1>, vector<16x16xf32>
    %c0_22 = arith.constant 0 : index
    %c0_23 = arith.constant 0 : index
    %c0_24 = arith.constant 0 : index
    %26 = vector.load %arg3[%c0_22, %c0_23, %c0_24] : memref<7x16x128xf32, #tpu.memory_space<vmem>>, vector<1x16x128xf32>
    %27 = vector.shape_cast %26 : vector<1x16x128xf32> to vector<16x128xf32>
    %cst_25 = arith.constant dense<0.000000e+00> : vector<16x128xf32>
    %28 = tpu.matmul %25, %27, %cst_25 {dimension_numbers = #tpu.dot_dimension_numbers<[1], [0], [0], [1], [0, 0, 1, 1], [], []>, precision = #tpu.contract_precision<fp32>} : vector<16x16xf32>, vector<16x128xf32>, vector<16x128xf32> -> vector<16x128xf32>
    %c1_26 = arith.constant 1 : index
    %c0_27 = arith.constant 0 : index
    %29 = vector.load %arg5[%c1_26, %c0_27] : memref<22x16xf32, #tpu.memory_space<vmem>>, vector<16x16xf32>
    %cst_28 = arith.constant 1.000000e+00 : f32
    %30 = vector.broadcast %cst_28 : f32 to vector<16x16xf32>
    %31 = arith.addf %13, %30 : vector<16x16xf32>
    %cst_29 = arith.constant 3.000000e+00 : f32
    %32 = vector.broadcast %cst_29 : f32 to vector<16x16xf32>
    %33 = arith.cmpf oge, %31, %32 : vector<16x16xf32>
    %cst_30 = arith.constant 1.000000e+00 : f32
    %34 = vector.broadcast %cst_30 : f32 to vector<16x16xf32>
    %35 = arith.addf %13, %34 : vector<16x16xf32>
    %cst_31 = arith.constant 1.900000e+01 : f32
    %36 = vector.broadcast %cst_31 : f32 to vector<16x16xf32>
    %37 = arith.cmpf olt, %35, %36 : vector<16x16xf32>
    %38 = arith.andi %33, %37 : vector<16x16xi1>
    %cst_32 = arith.constant 0.000000e+00 : f32
    %39 = vector.broadcast %cst_32 : f32 to vector<16x16xf32>
    %40 = arith.select %38, %29, %39 : vector<16x16xi1>, vector<16x16xf32>
    %c1_33 = arith.constant 1 : index
    %c0_34 = arith.constant 0 : index
    %c0_35 = arith.constant 0 : index
    %41 = vector.load %arg3[%c1_33, %c0_34, %c0_35] : memref<7x16x128xf32, #tpu.memory_space<vmem>>, vector<1x16x128xf32>
    %42 = vector.shape_cast %41 : vector<1x16x128xf32> to vector<16x128xf32>
    %cst_36 = arith.constant dense<0.000000e+00> : vector<16x128xf32>
    %43 = tpu.matmul %40, %42, %cst_36 {dimension_numbers = #tpu.dot_dimension_numbers<[1], [0], [0], [1], [0, 0, 1, 1], [], []>, precision = #tpu.contract_precision<fp32>} : vector<16x16xf32>, vector<16x128xf32>, vector<16x128xf32> -> vector<16x128xf32>
    %44 = arith.addf %28, %43 : vector<16x128xf32>
    %c2_37 = arith.constant 2 : index
    %c0_38 = arith.constant 0 : index
    %45 = vector.load %arg5[%c2_37, %c0_38] : memref<22x16xf32, #tpu.memory_space<vmem>>, vector<16x16xf32>
    %cst_39 = arith.constant 2.000000e+00 : f32
    %46 = vector.broadcast %cst_39 : f32 to vector<16x16xf32>
    %47 = arith.addf %13, %46 : vector<16x16xf32>
    %cst_40 = arith.constant 3.000000e+00 : f32
    %48 = vector.broadcast %cst_40 : f32 to vector<16x16xf32>
    %49 = arith.cmpf oge, %47, %48 : vector<16x16xf32>
    %cst_41 = arith.constant 2.000000e+00 : f32
    %50 = vector.broadcast %cst_41 : f32 to vector<16x16xf32>
    %51 = arith.addf %13, %50 : vector<16x16xf32>
    %cst_42 = arith.constant 1.900000e+01 : f32
    %52 = vector.broadcast %cst_42 : f32 to vector<16x16xf32>
    %53 = arith.cmpf olt, %51, %52 : vector<16x16xf32>
    %54 = arith.andi %49, %53 : vector<16x16xi1>
    %cst_43 = arith.constant 0.000000e+00 : f32
    %55 = vector.broadcast %cst_43 : f32 to vector<16x16xf32>
    %56 = arith.select %54, %45, %55 : vector<16x16xi1>, vector<16x16xf32>
    %c2_44 = arith.constant 2 : index
    %c0_45 = arith.constant 0 : index
    %c0_46 = arith.constant 0 : index
    %57 = vector.load %arg3[%c2_44, %c0_45, %c0_46] : memref<7x16x128xf32, #tpu.memory_space<vmem>>, vector<1x16x128xf32>
    %58 = vector.shape_cast %57 : vector<1x16x128xf32> to vector<16x128xf32>
    %cst_47 = arith.constant dense<0.000000e+00> : vector<16x128xf32>
    %59 = tpu.matmul %56, %58, %cst_47 {dimension_numbers = #tpu.dot_dimension_numbers<[1], [0], [0], [1], [0, 0, 1, 1], [], []>, precision = #tpu.contract_precision<fp32>} : vector<16x16xf32>, vector<16x128xf32>, vector<16x128xf32> -> vector<16x128xf32>
    %60 = arith.addf %44, %59 : vector<16x128xf32>
    %c3_48 = arith.constant 3 : index
    %c0_49 = arith.constant 0 : index
    %61 = vector.load %arg5[%c3_48, %c0_49] : memref<22x16xf32, #tpu.memory_space<vmem>>, vector<16x16xf32>
    %cst_50 = arith.constant 3.000000e+00 : f32
    %62 = vector.broadcast %cst_50 : f32 to vector<16x16xf32>
    %63 = arith.addf %13, %62 : vector<16x16xf32>
    %cst_51 = arith.constant 3.000000e+00 : f32
    %64 = vector.broadcast %cst_51 : f32 to vector<16x16xf32>
    %65 = arith.cmpf oge, %63, %64 : vector<16x16xf32>
    %cst_52 = arith.constant 3.000000e+00 : f32
    %66 = vector.broadcast %cst_52 : f32 to vector<16x16xf32>
    %67 = arith.addf %13, %66 : vector<16x16xf32>
    %cst_53 = arith.constant 1.900000e+01 : f32
    %68 = vector.broadcast %cst_53 : f32 to vector<16x16xf32>
    %69 = arith.cmpf olt, %67, %68 : vector<16x16xf32>
    %70 = arith.andi %65, %69 : vector<16x16xi1>
    %cst_54 = arith.constant 0.000000e+00 : f32
    %71 = vector.broadcast %cst_54 : f32 to vector<16x16xf32>
    %72 = arith.select %70, %61, %71 : vector<16x16xi1>, vector<16x16xf32>
    %c3_55 = arith.constant 3 : index
    %c0_56 = arith.constant 0 : index
    %c0_57 = arith.constant 0 : index
    %73 = vector.load %arg3[%c3_55, %c0_56, %c0_57] : memref<7x16x128xf32, #tpu.memory_space<vmem>>, vector<1x16x128xf32>
    %74 = vector.shape_cast %73 : vector<1x16x128xf32> to vector<16x128xf32>
    %cst_58 = arith.constant dense<0.000000e+00> : vector<16x128xf32>
    %75 = tpu.matmul %72, %74, %cst_58 {dimension_numbers = #tpu.dot_dimension_numbers<[1], [0], [0], [1], [0, 0, 1, 1], [], []>, precision = #tpu.contract_precision<fp32>} : vector<16x16xf32>, vector<16x128xf32>, vector<16x128xf32> -> vector<16x128xf32>
    %76 = arith.addf %60, %75 : vector<16x128xf32>
    %c4 = arith.constant 4 : index
    %c0_59 = arith.constant 0 : index
    %77 = vector.load %arg5[%c4, %c0_59] : memref<22x16xf32, #tpu.memory_space<vmem>>, vector<16x16xf32>
    %cst_60 = arith.constant 4.000000e+00 : f32
    %78 = vector.broadcast %cst_60 : f32 to vector<16x16xf32>
    %79 = arith.addf %13, %78 : vector<16x16xf32>
    %cst_61 = arith.constant 3.000000e+00 : f32
    %80 = vector.broadcast %cst_61 : f32 to vector<16x16xf32>
    %81 = arith.cmpf oge, %79, %80 : vector<16x16xf32>
    %cst_62 = arith.constant 4.000000e+00 : f32
    %82 = vector.broadcast %cst_62 : f32 to vector<16x16xf32>
    %83 = arith.addf %13, %82 : vector<16x16xf32>
    %cst_63 = arith.constant 1.900000e+01 : f32
    %84 = vector.broadcast %cst_63 : f32 to vector<16x16xf32>
    %85 = arith.cmpf olt, %83, %84 : vector<16x16xf32>
    %86 = arith.andi %81, %85 : vector<16x16xi1>
    %cst_64 = arith.constant 0.000000e+00 : f32
    %87 = vector.broadcast %cst_64 : f32 to vector<16x16xf32>
    %88 = arith.select %86, %77, %87 : vector<16x16xi1>, vector<16x16xf32>
    %c4_65 = arith.constant 4 : index
    %c0_66 = arith.constant 0 : index
    %c0_67 = arith.constant 0 : index
    %89 = vector.load %arg3[%c4_65, %c0_66, %c0_67] : memref<7x16x128xf32, #tpu.memory_space<vmem>>, vector<1x16x128xf32>
    %90 = vector.shape_cast %89 : vector<1x16x128xf32> to vector<16x128xf32>
    %cst_68 = arith.constant dense<0.000000e+00> : vector<16x128xf32>
    %91 = tpu.matmul %88, %90, %cst_68 {dimension_numbers = #tpu.dot_dimension_numbers<[1], [0], [0], [1], [0, 0, 1, 1], [], []>, precision = #tpu.contract_precision<fp32>} : vector<16x16xf32>, vector<16x128xf32>, vector<16x128xf32> -> vector<16x128xf32>
    %92 = arith.addf %76, %91 : vector<16x128xf32>
    %c5 = arith.constant 5 : index
    %c0_69 = arith.constant 0 : index
    %93 = vector.load %arg5[%c5, %c0_69] : memref<22x16xf32, #tpu.memory_space<vmem>>, vector<16x16xf32>
    %cst_70 = arith.constant 5.000000e+00 : f32
    %94 = vector.broadcast %cst_70 : f32 to vector<16x16xf32>
    %95 = arith.addf %13, %94 : vector<16x16xf32>
    %cst_71 = arith.constant 3.000000e+00 : f32
    %96 = vector.broadcast %cst_71 : f32 to vector<16x16xf32>
    %97 = arith.cmpf oge, %95, %96 : vector<16x16xf32>
    %cst_72 = arith.constant 5.000000e+00 : f32
    %98 = vector.broadcast %cst_72 : f32 to vector<16x16xf32>
    %99 = arith.addf %13, %98 : vector<16x16xf32>
    %cst_73 = arith.constant 1.900000e+01 : f32
    %100 = vector.broadcast %cst_73 : f32 to vector<16x16xf32>
    %101 = arith.cmpf olt, %99, %100 : vector<16x16xf32>
    %102 = arith.andi %97, %101 : vector<16x16xi1>
    %cst_74 = arith.constant 0.000000e+00 : f32
    %103 = vector.broadcast %cst_74 : f32 to vector<16x16xf32>
    %104 = arith.select %102, %93, %103 : vector<16x16xi1>, vector<16x16xf32>
    %c5_75 = arith.constant 5 : index
    %c0_76 = arith.constant 0 : index
    %c0_77 = arith.constant 0 : index
    %105 = vector.load %arg3[%c5_75, %c0_76, %c0_77] : memref<7x16x128xf32, #tpu.memory_space<vmem>>, vector<1x16x128xf32>
    %106 = vector.shape_cast %105 : vector<1x16x128xf32> to vector<16x128xf32>
    %cst_78 = arith.constant dense<0.000000e+00> : vector<16x128xf32>
    %107 = tpu.matmul %104, %106, %cst_78 {dimension_numbers = #tpu.dot_dimension_numbers<[1], [0], [0], [1], [0, 0, 1, 1], [], []>, precision = #tpu.contract_precision<fp32>} : vector<16x16xf32>, vector<16x128xf32>, vector<16x128xf32> -> vector<16x128xf32>
    %108 = arith.addf %92, %107 : vector<16x128xf32>
    %c6 = arith.constant 6 : index
    %c0_79 = arith.constant 0 : index
    %109 = vector.load %arg5[%c6, %c0_79] : memref<22x16xf32, #tpu.memory_space<vmem>>, vector<16x16xf32>
    %cst_80 = arith.constant 6.000000e+00 : f32
    %110 = vector.broadcast %cst_80 : f32 to vector<16x16xf32>
    %111 = arith.addf %13, %110 : vector<16x16xf32>
    %cst_81 = arith.constant 3.000000e+00 : f32
    %112 = vector.broadcast %cst_81 : f32 to vector<16x16xf32>
    %113 = arith.cmpf oge, %111, %112 : vector<16x16xf32>
    %cst_82 = arith.constant 6.000000e+00 : f32
    %114 = vector.broadcast %cst_82 : f32 to vector<16x16xf32>
    %115 = arith.addf %13, %114 : vector<16x16xf32>
    %cst_83 = arith.constant 1.900000e+01 : f32
    %116 = vector.broadcast %cst_83 : f32 to vector<16x16xf32>
    %117 = arith.cmpf olt, %115, %116 : vector<16x16xf32>
    %118 = arith.andi %113, %117 : vector<16x16xi1>
    %cst_84 = arith.constant 0.000000e+00 : f32
    %119 = vector.broadcast %cst_84 : f32 to vector<16x16xf32>
    %120 = arith.select %118, %109, %119 : vector<16x16xi1>, vector<16x16xf32>
    %c6_85 = arith.constant 6 : index
    %c0_86 = arith.constant 0 : index
    %c0_87 = arith.constant 0 : index
    %121 = vector.load %arg3[%c6_85, %c0_86, %c0_87] : memref<7x16x128xf32, #tpu.memory_space<vmem>>, vector<1x16x128xf32>
    %122 = vector.shape_cast %121 : vector<1x16x128xf32> to vector<16x128xf32>
    %cst_88 = arith.constant dense<0.000000e+00> : vector<16x128xf32>
    %123 = tpu.matmul %120, %122, %cst_88 {dimension_numbers = #tpu.dot_dimension_numbers<[1], [0], [0], [1], [0, 0, 1, 1], [], []>, precision = #tpu.contract_precision<fp32>} : vector<16x16xf32>, vector<16x128xf32>, vector<16x128xf32> -> vector<16x128xf32>
    %124 = arith.addf %108, %123 : vector<16x128xf32>
    %125 = vector.extract_strided_slice %124 {offsets = [0, 0], sizes = [16, 16], strides = [1, 1]} : vector<16x128xf32> to vector<16x16xf32>
    %126 = arith.negf %125 : vector<16x16xf32>
    %127 = math.exp %126 : vector<16x16xf32>
    %cst_89 = arith.constant 1.000000e+00 : f32
    %128 = vector.broadcast %cst_89 : f32 to vector<16x16xf32>
    %129 = arith.addf %128, %127 : vector<16x16xf32>
    %130 = arith.divf %128, %129 : vector<16x16xf32>
    %c0_90 = arith.constant 0 : index
    %c0_91 = arith.constant 0 : index
    %131 = vector.load %arg4[%c0_90, %c0_91] : memref<16x16xf32, #tpu.memory_space<vmem>>, vector<16x16xf32>
    tpu.vector_store %arg4[%c0_90, %c0_91], %130 {strides = array<i32>} : memref<16x16xf32, #tpu.memory_space<vmem>>, vector<16x16xf32>,
    return
  }
  func.func @transform_0(%arg0: i32) -> (i32, i32, i32, i32) {
    %c0_i32 = arith.constant 0 : i32
    %c0_i32_0 = arith.constant 0 : i32
    %c0_i32_1 = arith.constant 0 : i32
    %c0_i32_2 = arith.constant 0 : i32
    return %arg0, %c0_i32, %c0_i32_0, %c0_i32_1 : i32, i32, i32, i32
  }
  func.func @transform_1(%arg0: i32) -> (i32, i32) {
    %c0_i32 = arith.constant 0 : i32
    %c0_i32_0 = arith.constant 0 : i32
    %c0_i32_1 = arith.constant 0 : i32
    return %c0_i32, %c0_i32_0 : i32, i32
  }
  func.func @transform_2(%arg0: i32) -> (i32, i32, i32) {
    %c0_i32 = arith.constant 0 : i32
    %c0_i32_0 = arith.constant 0 : i32
    %c0_i32_1 = arith.constant 0 : i32
    %c0_i32_2 = arith.constant 0 : i32
    return %c0_i32, %c0_i32_0, %c0_i32_1 : i32, i32, i32
  }
  func.func @transform_3(%arg0: i32) -> (i32, i32) {
    %c0_i32 = arith.constant 0 : i32
    %c0_i32_0 = arith.constant 0 : i32
    return %arg0, %c0_i32 : i32, i32
  }
}

</mosaic_0001>

<bundles_post_ra>
// kernel: tpu_custom_call.1
= control target key start
LH: loop header
LB: loop body
LE: loop exit
PB: predicated region body
PF: predicated region fallthrough
CT: control target
= control target key end

     0   :  { %8 = vsyncpa [#allocation4], 0  ;;  %s5663_s0 = inlined_call_operand.hbm [shape: f32[2,4,16,16], index: 0, kind: input, shape index: {}]   ;;  %s5664_s1 = inlined_call_operand.hbm [shape: f32[16,16], index: 1, kind: input, shape index: {}]   ;;  %s5665_s2 = inlined_call_operand.hbm [shape: f32[7,16,128], index: 2, kind: input, shape index: {}]   ;;  %s5666_s3 = inlined_call_operand.vmem [shape: f32[32,16], index: 3, kind: output, shape index: {}]  }
   0x1   :  { %10 = vsyncpa [#allocation4 + $0x1], 0 }
   0x2   :  { %11 = vsyncpa [#allocation6], 0  ;;  %s4972_s12 = smov 0   ;;  %s4974_s13 = smov 0  }
   0x3   :  { %s4976_s14 = smov 0   ;;  %s4978_s15 = smov 0  }
   0x4 LB: > { %s4013_s16 = sadd.s32 4294967295, %s4945_s15   ;;  %p37_p0 = scmp.ne.s32.totalorder %s4937_s13, %s4933_s12  ;;  %s4945_s15 = sphi %s4978_s15, %s5706_s15   ;;  %s4941_s14 = sphi %s4976_s14, %s5705_s14   ;;  %s4937_s13 = sphi %s4974_s13, %s5704_s13   ;;  %s4933_s12 = sphi %s4972_s12, %s5703_s12  }
   0x5   : > { %p4994_p1 = scmp.eq.s32.totalorder %s4013_s16, 0  ;;  %p4015_p2 = scmp.ge.s32.totalorder %s4945_s15, 1 }
   0x6   : > { %p116_p3 = scmp.lt.s32.totalorder %s4945_s15, 3  ;;  %s4947_s20 = smov [#allocation5]  }
   0x7   : > { %s5671_s17 = scalar_select %p4994_p1, 1, 0 }
   0x8   : > { %p5002_p4 = por %p4994_p1, %p37_p0  ;;  %p5006_p5 = pnand %p4015_p2, %p116_p3 }
   0x9   : > { %s128_s21 = sshll.u32 %s4947_s20, 4  ;;  %s4948_s23 = smov [#allocation7]   ;;  %s129_s21 = int_to_ptr.vmem [resolvable:$true] %s128_s21 }
   0xa   : > { %s5672_s18 = scalar_select %p5002_p4, 1, 0 }
   0xb   : > { %s5673_s19 = scalar_select %p5006_p5, 1, 0 }
   0xc   : > { %p4761_p6 = pneg %p5006_p5  ;;  %s141_s24 = sshll.u32 %s4948_s23, 4  ;;  %s5018_s24 = int_to_ptr.vmem [resolvable:$true] %s141_s24 }
   0xd   : > { %s4821_s27 = scalar_lea.hbm %s5664_s1, 256 }
   0xe   : > { %p5014_p7 = pnand %p4761_p6, %p4994_p1  ;;  %p4822_p8 = scmp.ne.s32.totalorder %s5664_s1, %s4821_s27 }
   0xf   : > { %p4828_p12 = scmp.lt.u32.totalorder %s4821_s27, %s5664_s1 }
  0x10   : > { %p4823_p9 = pneg %p5014_p7 }
  0x12   : > { %p4824_p10 = pnand %p4823_p9, %p4822_p8 }
  0x14   : > { %p4825_p11 = pneg %p4824_p10 }
  0x16   : > { %p4830_p13 = pnand %p4828_p12, %p4825_p11 }
  0x18   : > { %4833 = shalt.err (!%p4830_p13)
}
  0x19   : > { %s4834_s5 = scalar_lea.vmem %s129_s21, 256  ;;  %p4842_p6 = scmp.lt.s32.totalorder %s129_s21, %s129_s21 }
  0x1a   : > { %p4835_p0 = scmp.ne.s32.totalorder %s129_s21, %s4834_s5  ;;  %p4843_p1 = scmp.lt.s32.totalorder %s4834_s5, %s4834_s5 }
  0x1c   : > { %p4837_p2 = pnand %p4835_p0, %p4823_p9  ;;  %p4844_p4 = por %p4843_p1, %p4842_p6 }
  0x1e   : > { %p4838_p3 = pneg %p4837_p2 }
  0x20   : > { %p4845_p5 = pnand %p4844_p4, %p4838_p3 }
  0x22   : > { %4848 = shalt.err (!%p4845_p5)
}
  0x23   : > { %s4949_s6 = smov 128   ;;  %s4950_s7 = smov 8  }
  0x24   : > { %4764 = dma.hbm_to_vmem [thread:$0]  (!%p5014_p7), %s5664_s1, 256, %s129_s21, [#allocation6], %s4949_s6, %s4949_s6, %s4950_s7  }
  0x25   : > { %s4849_s12 = scalar_lea.hbm %s5665_s2, 1792 }
  0x26   : > { %p4850_p1 = scmp.ne.s32.totalorder %s5665_s2, %s4849_s12  ;;  %p4856_p8 = scmp.lt.u32.totalorder %s4849_s12, %s5665_s2 }
  0x28   : > { %p4852_p4 = pnand %p4850_p1, %p4823_p9 }
  0x2a   : > { %p4853_p5 = pneg %p4852_p4 }
  0x2c   : > { %p4858_p10 = pnand %p4856_p8, %p4853_p5 }
  0x2e   : > { %4861 = shalt.err (!%p4858_p10)
}
  0x2f   : > { %s4862_s21 = scalar_lea.vmem %s5018_s24, 1792  ;;  %p4870_p0 = scmp.lt.s32.totalorder %s5018_s24, %s5018_s24 }
  0x30   : > { %p4863_p11 = scmp.ne.s32.totalorder %s5018_s24, %s4862_s21  ;;  %p4871_p2 = scmp.lt.s32.totalorder %s4862_s21, %s4862_s21 }
  0x32   : > { %p4865_p12 = pnand %p4863_p11, %p4823_p9  ;;  %p4872_p3 = por %p4871_p2, %p4870_p0 }
  0x34   : > { %p4866_p13 = pneg %p4865_p12 }
  0x36   : > { %p4873_p6 = pnand %p4872_p3, %p4866_p13 }
  0x38   : > { %4876 = shalt.err (!%p4873_p6)
}
  0x39   : > { %4767 = dma.hbm_to_vmem [thread:$0]  (!%p5014_p7), %s5665_s2, 1792, %s5018_s24, [#allocation6], %s4949_s6, %s4949_s6, %s4950_s7  }
  0x3a   : > { %s5074_s29 = sadd.s32 1, %s4945_s15   ;;  %s24_s22 = sadd.s32 1, %s4941_s14 }
  0x3b   : > { %s21_s30 = ssub.s32 %s4945_s15, %s5074_s29  ;;  %p31_p9 = scmp.ne.s32.totalorder %s4941_s14, %s4937_s13 }
  0x3c   : > { %p22_p1 = scmp.eq.s32.totalorder %s21_s30, 0  ;;  %p32_p4 = scmp.eq.s32.totalorder %s4945_s15, 0 }
  0x3d   : > { %p4774_p5 = scmp.lt.s32.totalorder %s4945_s15, 2  ;;  %s155_s4 = sand.u32 1, %s4941_s14  }
  0x3e   : > { %s5085_s5 = scalar_select %p22_p1, %s4941_s14, %s24_s22  }
  0x3f   : > { %p33_p8 = por %p32_p4, %p31_p9  ;;  %s4019_s8 = sshll.u32 %s155_s4, 6 }
  0x40   : > { %s4038_s9 = sshll.u32 %s4945_s15, 10  ;;  %s159_s24 = scalar_lea.vmem [#allocation3], %s4019_s8 }
  0x41   : > { %s5091_s12 = scalar_lea.hbm %s5663_s0, %s4038_s9  ;;  %s166_s20 = sshll.u32 %s159_s24, 4  ;;  %s5097_s20 = int_to_ptr.vmem [resolvable:$true] %s166_s20 }
  0x42   : > { %p5093_p7 = pnand %p4774_p5, %p33_p8  ;;  %s5099_s25 = scalar_lea.sflag [#allocation4], %s155_s4 }
  0x43   : > { %s4877_s26 = scalar_lea.hbm %s5091_s12, 1024  ;;  %s4882_s28 = scalar_lea.hbm %s5663_s0, 2048 }
  0x44   : > { %p4878_p10 = scmp.ne.s32.totalorder %s5091_s12, %s4877_s26  ;;  %p4879_p11 = pneg %p5093_p7 }
  0x45   : > { %p4883_p0 = scmp.lt.u32.totalorder %s5091_s12, %s5663_s0  ;;  %p4884_p2 = scmp.lt.u32.totalorder %s4882_s28, %s4877_s26 }
  0x46   : > { %p4880_p12 = pnand %p4879_p11, %p4878_p10  ;;  %p4886_p6 = scmp.lt.u32.totalorder %s4877_s26, %s5091_s12 }
  0x47   : > { %p4885_p3 = por %p4884_p2, %p4883_p0 }
  0x48   : > { %p4881_p13 = pneg %p4880_p12 }
  0x49   : > { %p4887_p9 = por %p4886_p6, %p4885_p3 }
  0x4b   : > { %p4888_p1 = pnand %p4887_p9, %p4881_p13 }
  0x4d   : > { %4891 = shalt.err (!%p4888_p1)
}
  0x4e   : > { %s4892_s4 = scalar_lea.vmem %s5097_s20, 1024  ;;  %s4951_s8 = smov [#allocation3]  }
  0x4f   : > { %p4893_p4 = scmp.ne.s32.totalorder %s5097_s20, %s4892_s4  ;;  %s4897_s9 = sshll.u32 %s4951_s8, 4  ;;  %s4898_s9 = int_to_ptr.vmem [resolvable:$false] %s4897_s9 }
  0x50   : > { %s4899_s10 = scalar_lea.vmem %s4898_s9, 2048  ;;  %p4900_p10 = scmp.lt.s32.totalorder %s5097_s20, %s4898_s9 }
  0x51   : > { %p4895_p5 = pnand %p4893_p4, %p4879_p11  ;;  %p4901_p12 = scmp.lt.s32.totalorder %s4899_s10, %s4892_s4 }
  0x53   : > { %p4896_p8 = pneg %p4895_p5  ;;  %p4902_p0 = por %p4901_p12, %p4900_p10 }
  0x55   : > { %p4903_p2 = pnand %p4902_p0, %p4896_p8 }
  0x57   : > { %4906 = shalt.err (!%p4903_p2)
}
  0x58   : > { %4771 = dma.hbm_to_vmem [thread:$0]  (!%p5093_p7), %s5091_s12, 1024, %s5097_s20, %s5099_s25, %s4949_s6, %s4949_s6, %s4950_s7  }
  0x59   : > { %p5676_p11 = scmp.ne.s32.totalorder %s5673_s19, 0 }
  0x5a   : > { %s180_s11 = sand.u32 (!%p5676_p11), 1, %s4937_s13   ;;  %p5677_p13 = scmp.ne.s32.totalorder (!%p5676_p11), %s5672_s18, 0 }
  0x5b   : > { %178 = sbr.rel (%p5676_p11) target bundleno = 536 (0x218), region = 32  ;;  %s4023_s24 = sshll.u32 (!%p5676_p11), %s180_s11, 6 }
  0x5c   : > { %s181_s26 = scalar_lea.sflag (!%p5676_p11), [#allocation4], %s180_s11  ;;  %s5133_s21 = scalar_lea.vmem (!%p5676_p11), [#allocation3], %s4023_s24 }
  0x62   : > { %4924 = dma.done.wait (%p5677_p13), %s181_s26, 1024  }
  0x63   : > { %4926 = vsyncadd (%p5677_p13), %s181_s26, 4294966272  ;;  %p5678_p3 = scmp.ne.s32.totalorder %s5671_s17, 0 }
  0x65   : > { %4928 = dma.done.wait (%p5678_p3), [#allocation6], 2048  }
  0x66   : > { %4930 = vsyncadd (%p5678_p3), [#allocation6], 4294965248  ;;  %v1826_v0 = vld [vmem:[#allocation7 + $0x30] sm:$0xff]  ;;  %v1827_v1 = vld [vmem:[#allocation7 + $0x38] sm:$0xff]  ;;  %vm238_vm0 = vcmask 130048   ;;  %s4026_s17 = sshll.u32 %s4013_s16, 1 }
  0x67   : > { %v270_v2 = vld [vmem:[#allocation7 + $0x10] sm:$0xff]  ;;  %v1835_v3 = vand.u32 4294901760, %v1826_v0  ;;  %v1838_v4 = vand.u32 4294901760, %v1827_v1  ;;  %v271_v5 = vld [vmem:[#allocation7 + $0x18] sm:$0xff]  ;;  %v4028_v8 = vld [vmem:[%s5133_s21 + $0x10] sm:$0xff]  ;;  %p216_p7 = scmp.lt.s32.totalorder %s4026_s17, 3 }
  0x68   : > { %v279_v6 = vand.u32 4294901760, %v270_v2  ;;  %v221_v7 = vld [vmem:[%s5133_s21] sm:$0xff]  ;;  %v282_v9 = vand.u32 4294901760, %v271_v5  ;;  %v4032_v12 = vld [vmem:[%s5133_s21 + $0x30] sm:$0xff]  ;;  %v222_v15 = vld [vmem:[%s5133_s21 + $0x8] sm:$0xff] }
  0x69   : > { %v226_v10 = vmax.f32 %v221_v7, %v4028_v8  ;;  %v4030_v11 = vld [vmem:[%s5133_s21 + $0x20] sm:$0xff]  ;;  %v5149_v14 = vpack.c.bf16 %v1838_v4, %v1835_v3  ;;  %v4029_v16 = vld [vmem:[%s5133_s21 + $0x18] sm:$0xff]  ;;  %v4031_v17 = vld [vmem:[%s5133_s21 + $0x28] sm:$0xff]  ;;  %v5172_v32 = vsub.f32 %v1826_v0, %v1835_v3  ;;  %v5178_v35 = vsub.f32 %v1827_v1, %v1838_v4  ;;  %s5708_s17 = smov (!%p216_p7, %s4026_s17), 3 }
  0x6a   : > { %v5147_v13 = vld [vmem:[#allocation5] sm:$0xff]  ;;  %v5154_v18 = vsub.f32 %v270_v2, %v279_v6  ;;  %v5156_v19 = vpack.c.bf16 %v282_v9, %v279_v6  ;;  %v227_v21 = vmax.f32 %v222_v15, %v4029_v16  ;;  %v5158_v22 = vld [vmem:[#allocation5 + $0x8] sm:$0xff]  ;;  %v5160_v23 = vsub.f32 %v271_v5, %v282_v9  ;;  %v4033_v25 = vld [vmem:[%s5133_s21 + $0x38] sm:$0xff]  ;;  %s4027_s18 = sshll.u32 %s5708_s17, 3 }
  0x6b   : > { %v231_v20 = vmax.f32 %v226_v10, %v4030_v11  ;;  %4586 = vmatprep.subr.bf16.mxu0 %v5149_v14  ;;  %v1815_v24 = vadd.f32 3.0, %v5147_v13  ;;  %v259_v28 = vadd.f32 1.0, %v5147_v13  ;;  %v1816_v30 = vadd.f32 3.0, %v5158_v22  ;;  %v5203_v48 = vld [vmem:[#allocation7 + $0x40] sm:$0xff]  ;;  %v2352_v55 = vld [vmem:[#allocation7 + $0x48] sm:$0xff]  ;;  %s219_s7 = scalar_lea.vmem %s5666_s3, %s4027_s18 }
  0x6c   : > { %4588 = vmatpush3.bf16.msra.mxu0 %v5149_v14  ;;  %4502 = vmatprep.subr.bf16.mxu1 %v5156_v19  ;;  %v232_v27 = vmax.f32 %v227_v21, %v4031_v17  ;;  %v368_v29 = vand.u32 4294901760, %v5154_v18  ;;  %v375_v31 = vand.u32 4294901760, %v5160_v23  ;;  %v260_v36 = vadd.f32 1.0, %v5158_v22 }
  0x6d   : > { %v236_v26 = vmax.f32 %v231_v20, %v4032_v12  ;;  %4504 = vmatpush3.bf16.msra.mxu1 %v5156_v19  ;;  %vm1817_vm1 = vcmp.ge.f32.partialorder %v1815_v24, 3.0  ;;  %vm1819_vm2 = vcmp.lt.f32.partialorder %v1815_v24, 19.0  ;;  %v1924_v38 = vand.u32 4294901760, %v5172_v32 }
  0x6e   : > { %v237_v33 = vmax.f32 %v232_v27, %v4033_v25  ;;  %v369_v34 = vsub.f32 %v5154_v18, %v368_v29  ;;  %v376_v37 = vsub.f32 %v5160_v23, %v375_v31  ;;  %vm261_vm3 = vcmp.ge.f32.partialorder %v259_v28, 3.0  ;;  %vm5188_vm7 = vmand %vm1817_vm1, %vm1819_vm2 }
  0x6f   : > { %239 = vst.msk [vmem:[#allocation2 + $0x3] sm:$0xff] %vm238_vm0, %v236_v26  ;;  %vm263_vm4 = vcmp.lt.f32.partialorder %v259_v28, 19.0  ;;  %v1931_v40 = vand.u32 4294901760, %v5178_v35  ;;  %vm1818_vm5 = vcmp.ge.f32.partialorder %v1816_v30, 3.0  ;;  %vm1820_vm6 = vcmp.lt.f32.partialorder %v1816_v30, 19.0 }
  0x70   : > { %240 = vst.msk [vmem:[#allocation2 + $0xb] sm:$0xff] %vm238_vm0, %v237_v33  ;;  %v370_v39 = vand.u32 4294901760, %v369_v34  ;;  %v377_v41 = vand.u32 4294901760, %v376_v37  ;;  %v2340_v42 = vadd.f32 4.0, %v5147_v13  ;;  %vm262_vm8 = vcmp.ge.f32.partialorder %v260_v36, 3.0  ;;  %vm5197_vm10 = vmand %vm261_vm3, %vm263_vm4 }
  0x71   : > { %v4589_v44 = vpack.c.bf16 %v1931_v40, %v1924_v38  ;;  %vm264_vm9 = vcmp.lt.f32.partialorder %v260_v36, 19.0  ;;  %v2341_v45 = vadd.f32 4.0, %v5158_v22  ;;  %vm5205_vm13 = vmand %vm1818_vm5, %vm1820_vm6  ;;  %v2360_v56 = vand.u32 4294901760, %v5203_v48 }
  0x72   : > { %v5201_v47 = vpack.c.bf16 %v377_v41, %v370_v39  ;;  %vm2342_vm11 = vcmp.ge.f32.partialorder %v2340_v42, 3.0  ;;  %vm2344_vm12 = vcmp.lt.f32.partialorder %v2340_v42, 19.0  ;;  %vm5210_vm14 = vmand %vm262_vm8, %vm264_vm9  ;;  %v2363_v5 = vand.u32 4294901760, %v2352_v55 }
  0x73   : > { %4590 = vmatprep.subr.bf16.mxu0 %v4589_v44  ;;  %vm5219_vm15 = vmand %vm2342_vm11, %vm2344_vm12  ;;  %vm2343_vm1 = vcmp.ge.f32.partialorder %v2341_v45, 3.0  ;;  %vm2345_vm2 = vcmp.lt.f32.partialorder %v2341_v45, 19.0  ;;  %v5265_v25 = vsub.f32 %v5203_v48, %v2360_v56  ;;  %v4509_v42 = vpack.c.bf16 %v5160_v23, %v5154_v18 }
  0x74   : > { %4506 = vmatprep.subr.bf16.mxu1 %v5201_v47  ;;  %vm5250_vm3 = vmand %vm2343_vm1, %vm2345_vm2  ;;  %v5267_v26 = vsub.f32 %v2352_v55, %v2363_v5  ;;  %v5298_v48 = vpack.c.bf16 %v2363_v5, %v2360_v56  ;;  %vm247_vm4 = vcmp.ge.f32.partialorder %v5147_v13, 3.0  ;;  %vm249_vm5 = vcmp.lt.f32.partialorder %v5147_v13, 19.0 }
  0x75   : > { %v2449_v43 = vand.u32 4294901760, %v5265_v25  ;;  %vm5326_vm6 = vmand %vm247_vm4, %vm249_vm5  ;;  %vm250_vm8 = vcmp.lt.f32.partialorder %v5158_v22, 19.0 }
  0x76   : > { %v1813_v50 = vld [vmem:[#allocation2 + $0x3] sm:$0xff]  ;;  %v2456_v45 = vand.u32 4294901760, %v5267_v26  ;;  %v4605_v18 = vpack.c.bf16 %v5267_v26, %v5265_v25 }
  0x77   : > { %v257_v51 = vld [vmem:[#allocation2 + $0x1] sm:$0xff]  ;;  %v1823_v53 = vsel %vm5188_vm7, %v1813_v50, 0.0  ;;  %v1814_v59 = vld [vmem:[#allocation2 + $0xb] sm:$0xff]  ;;  %v2450_v49 = vsub.f32 %v5265_v25, %v2449_v43  ;;  %vm248_vm7 = vcmp.ge.f32.partialorder %v5158_v22, 3.0 }
  0x78   : > { %v267_v54 = vsel %vm5197_vm10, %v257_v51, 0.0  ;;  %v1829_v58 = vsel %vm238_vm0, %v1823_v53, 0  ;;  %v258_v61 = vld [vmem:[#allocation2 + $0x9] sm:$0xff]  ;;  %v1824_v0 = vsel %vm5205_vm13, %v1814_v59, 0.0  ;;  %v2457_v50 = vsub.f32 %v5267_v26, %v2456_v45  ;;  %vm252_vm9 = vmand %vm248_vm7, %vm250_vm8 }
  0x79   : > { %v273_v60 = vsel %vm238_vm0, %v267_v54, 0  ;;  %v2338_v62 = vld [vmem:[#allocation2 + $0x4] sm:$0xff]  ;;  %v5225_v63 = vand.u32 4294901760, %v1829_v58  ;;  %v268_v2 = vsel %vm5210_vm14, %v258_v61, 0.0  ;;  %v1832_v3 = vsel %vm238_vm0, %v1824_v0, 0  ;;  %v2339_v12 = vld [vmem:[#allocation2 + $0xc] sm:$0xff] }
  0x7a   : > { %v5229_v1 = vand.u32 4294901760, %v273_v60  ;;  %v276_v4 = vsel %vm238_vm0, %v268_v2, 0  ;;  %v2348_v6 = vsel %vm5219_vm15, %v2338_v62, 0.0  ;;  %v5240_v8 = vand.u32 4294901760, %v1832_v3  ;;  %v255_v61 = vld [vmem:[#allocation7] sm:$0xff]  ;;  %v256_v62 = vld [vmem:[#allocation7 + $0x8] sm:$0xff] }
  0x7b   : > { %v5238_v7 = vsub.f32 %v1829_v58, %v5225_v63  ;;  %v5245_v10 = vand.u32 4294901760, %v276_v4  ;;  %v2354_v11 = vsel %vm238_vm0, %v2348_v6, 0  ;;  %v2349_v33 = vsel %vm5250_vm3, %v2339_v12, 0.0  ;;  %v243_v58 = vld [vmem:[#allocation2] sm:$0xff] }
  0x7c   : > { %v5243_v9 = vsub.f32 %v273_v60, %v5229_v1  ;;  %v5256_v17 = vsub.f32 %v1832_v3, %v5240_v8  ;;  %v5262_v24 = vand.u32 4294901760, %v2354_v11  ;;  %v2357_v39 = vsel %vm238_vm0, %v2349_v33, 0  ;;  %v244_v3 = vld [vmem:[#allocation2 + $0x8] sm:$0xff] }
  0x7d   : > { %v1903_v16 = vand.u32 4294901760, %v5238_v7  ;;  %v5260_v21 = vsub.f32 %v276_v4, %v5245_v10  ;;  %v2451_v52 = vand.u32 4294901760, %v2450_v49  ;;  %v2458_v53 = vand.u32 4294901760, %v2457_v50 }
  0x7e   : > { %v347_v20 = vand.u32 4294901760, %v5243_v9  ;;  %v1913_v27 = vand.u32 4294901760, %v5256_v17  ;;  %v5285_v37 = vsub.f32 %v2354_v11, %v5262_v24  ;;  %v4517_v60 = vpack.c.bf16 %v375_v31, %v368_v29 }
  0x7f   : > { %4358 = vmatprep.mubr.f32.mxu0 %v1903_v16  ;;  %v357_v30 = vand.u32 4294901760, %v5260_v21  ;;  %v4601_v56 = vpack.c.bf16 %v2458_v53, %v2451_v52  ;;  %v253_v0 = vsel %vm5326_vm6, %v243_v58, 0.0  ;;  %v787_v23 = vand.u32 4294901760, %v255_v61  ;;  %v2877_v58 = vld [vmem:[#allocation7 + $0x58] sm:$0xff] }
  0x80   : > { %v348_v28 = vsub.f32 %v5243_v9, %v347_v20  ;;  %4359 = vmatmul.mubr.f32.vlgmr.msra.gmra.mrb[0].mxu0 %v1913_v27  ;;  %v2428_v46 = vand.u32 4294901760, %v5285_v37  ;;  %v790_v29 = vand.u32 4294901760, %v256_v62  ;;  %v781_v31 = vsel %vm238_vm0, %v253_v0, 0 }
  0x81   : > { %v358_v36 = vsub.f32 %v5260_v21, %v357_v30  ;;  %4592 = vmatpush3.bf16.msra.mxu0 %v4589_v44  ;;  %4365 = vmatprep.mubr.f32.mxu0 %v5225_v63  ;;  %v5293_v44 = vand.u32 4294901760, %v2357_v39  ;;  %v5347_v4 = vand.u32 4294901760, %v781_v31  ;;  %v5349_v5 = vsub.f32 %v255_v61, %v787_v23 }
  0x82   : > { %v349_v34 = vand.u32 4294901760, %v348_v28  ;;  %4594 = vmatprep.subr.bf16.mxu0 %v5149_v14  ;;  %v5351_v6 = vsub.f32 %v256_v62, %v790_v29  ;;  %v1925_v11 = vsub.f32 %v5172_v32, %v1924_v38  ;;  %v1932_v33 = vsub.f32 %v5178_v35, %v1931_v40 }
  0x83   : > { %v359_v41 = vand.u32 4294901760, %v358_v36  ;;  %v5308_v51 = vsub.f32 %v2357_v39, %v5293_v44  ;;  %v5360_v12 = vsub.f32 %v781_v31, %v5347_v4  ;;  %v876_v28 = vand.u32 4294901760, %v5349_v5 }
  0x84   : > { %4211 = vmatprep.mubr.f32.mxu1 %v349_v34  ;;  %v1926_v38 = vand.u32 4294901760, %v1925_v11  ;;  %v5377_v36 = vpack.c.bf16 %v5178_v35, %v5172_v32  ;;  %v5379_v39 = vpack.c.bf16 %v790_v29, %v787_v23  ;;  %v2863_v32 = vld [vmem:[#allocation2 + $0x5] sm:$0xff]  ;;  %v2866_v50 = vadd.f32 5.0, %v5158_v22 }
  0x85   : > { %4212 = vmatmul.mubr.f32.vlgmr.msra.gmra.mrb[0].mxu1 %v359_v41  ;;  %v2438_v54 = vand.u32 4294901760, %v5308_v51  ;;  %v855_v34 = vand.u32 4294901760, %v5360_v12  ;;  %v877_v41 = vsub.f32 %v5349_v5, %v876_v28  ;;  %v4533_v29 = vpack.c.bf16 %v5351_v6, %v5349_v5  ;;  %v1288_v35 = vld [vmem:[#allocation2 + $0x2] sm:$0xff] }
  0x86   : > { %4508 = vmatpush3.bf16.msra.mxu1 %v5201_v47  ;;  %4218 = vmatprep.mubr.f32.mxu1 %v5229_v1  ;;  %v2429_v47 = vsub.f32 %v5285_v37, %v2428_v46  ;;  %vm2868_vm13 = vcmp.ge.f32.partialorder %v2866_v50, 3.0  ;;  %vm2870_vm14 = vcmp.lt.f32.partialorder %v2866_v50, 19.0 }
  0x87   : > { %4510 = vmatprep.subr.bf16.mxu1 %v4509_v42  ;;  %v2439_v57 = vsub.f32 %v5308_v51, %v2438_v54  ;;  %v856_v52 = vsub.f32 %v5360_v12, %v855_v34  ;;  %v878_v53 = vand.u32 4294901760, %v877_v41  ;;  %vm5417_vm15 = vmand %vm2868_vm13, %vm2870_vm14 }
  0x88   : > { %4366 = vmatmul.mubr.f32.vlgmr.msra.gmra.mrb[0].mxu0 %v5240_v8  ;;  %v2430_v55 = vand.u32 4294901760, %v2429_v47 }
  0x89   : > { %4596 = vmatpush3.bf16.msra.mxu0 %v5149_v14  ;;  %4372 = vmatprep.mubr.f32.mxu0 %v5225_v63  ;;  %v2440_v2 = vand.u32 4294901760, %v2439_v57  ;;  %v2876_v57 = vld [vmem:[#allocation7 + $0x50] sm:$0xff]  ;;  %v857_v25 = vand.u32 4294901760, %v856_v52  ;;  %v1291_v52 = vadd.f32 2.0, %v5158_v22 }
  0x8a   : > { %4598 = vmatprep.subr.bf16.mxu0 %v5298_v48  ;;  %v2885_v26 = vand.u32 4294901760, %v2876_v57 }
  0x8b   : > { %vm1293_vm4 = vcmp.ge.f32.partialorder %v1291_v52, 3.0  ;;  %vm1295_vm5 = vcmp.lt.f32.partialorder %v1291_v52, 19.0 }
  0x8c   : > { %v5430_v0 = vsub.f32 %v2876_v57, %v2885_v26  ;;  %vm1297_vm6 = vmand %vm1293_vm4, %vm1295_vm5 }
  0x8d   : > { %4219 = vmatmul.mubr.f32.vlgmr.msra.gmra.mrb[0].mxu1 %v5245_v10 }
  0x8e   : > { %4512 = vmatpush3.bf16.msra.mxu1 %v4509_v42  ;;  %4225 = vmatprep.mubr.f32.mxu1 %v5243_v9  ;;  %v254_v9 = vsel %vm252_vm9, %v244_v3, 0.0  ;;  %v1933_v42 = vand.u32 4294901760, %v1932_v33  ;;  %v2974_v31 = vand.u32 4294901760, %v5430_v0  ;;  %v1290_v33 = vadd.f32 2.0, %v5147_v13 }
  0x8f   : > { %4514 = vmatprep.subr.bf16.mxu1 %v5156_v19  ;;  %v784_v15 = vsel %vm238_vm0, %v254_v9, 0 }
  0x90   : > { %4373 = vmatmul.mubr.f32.vlgmr.msra.gmra.mrb[0].mxu0 %v5240_v8  ;;  %v5397_v47 = vpack.c.bf16 %v1933_v42, %v1926_v38  ;;  %v2975_v11 = vsub.f32 %v5430_v0, %v2974_v31  ;;  %vm1292_vm1 = vcmp.ge.f32.partialorder %v1290_v33, 3.0  ;;  %vm1294_vm2 = vcmp.lt.f32.partialorder %v1290_v33, 19.0 }
  0x91   : > { %4600 = vmatpush3.bf16.msra.mxu0 %v5298_v48  ;;  %4379 = vmatprep.mubr.f32.mxu0 %v2430_v55  ;;  %vm5477_vm3 = vmand %vm1292_vm1, %vm1294_vm2 }
  0x92   : > { %4602 = vmatprep.subr.bf16.mxu0 %v4601_v56  ;;  %v2976_v41 = vand.u32 4294901760, %v2975_v11 }
  0x95   : > { %4226 = vmatmul.mubr.f32.vlgmr.msra.gmra.mrb[0].mxu1 %v5260_v21  ;;  %v883_v21 = vand.u32 4294901760, %v5351_v6 }
  0x96   : > { %4516 = vmatpush3.bf16.msra.mxu1 %v5156_v19  ;;  %4232 = vmatprep.mubr.f32.mxu1 %v347_v20  ;;  %v2865_v20 = vadd.f32 5.0, %v5147_v13 }
  0x97   : > { %4518 = vmatprep.subr.bf16.mxu1 %v4517_v60  ;;  %v884_v40 = vsub.f32 %v5351_v6, %v883_v21 }
  0x98   : > { %4380 = vmatmul.mubr.f32.vlgmr.msra.gmra.mrb[0].mxu0 %v2440_v2  ;;  %vm2867_vm10 = vcmp.ge.f32.partialorder %v2865_v20, 3.0  ;;  %vm2869_vm11 = vcmp.lt.f32.partialorder %v2865_v20, 19.0 }
  0x99   : > { %4604 = vmatpush3.bf16.msra.mxu0 %v4601_v56  ;;  %4386 = vmatprep.mubr.f32.mxu0 %v5262_v24  ;;  %vm5392_vm12 = vmand %vm2867_vm10, %vm2869_vm11  ;;  %v885_v55 = vand.u32 4294901760, %v884_v40  ;;  %v4613_v56 = vpack.c.bf16 %v2456_v45, %v2449_v43  ;;  %v2888_v43 = vand.u32 4294901760, %v2877_v58 }
  0x9a   : > { %4606 = vmatprep.subr.bf16.mxu0 %v4605_v18 }
  0x9b   : > { %v4529_v59 = vpack.c.bf16 %v885_v55, %v878_v53  ;;  %v5432_v2 = vsub.f32 %v2877_v58, %v2888_v43  ;;  %v5450_v9 = vpack.c.bf16 %v2888_v43, %v2885_v26  ;;  %v4541_v53 = vpack.c.bf16 %v883_v21, %v876_v28  ;;  %v1302_v55 = vld [vmem:[#allocation7 + $0x28] sm:$0xff] }
  0x9c   : > { %v1313_v28 = vand.u32 4294901760, %v1302_v55  ;;  %v1289_v58 = vld [vmem:[#allocation2 + $0xa] sm:$0xff]  ;;  %v3390_v43 = vadd.f32 6.0, %v5147_v13 }
  0x9d   : > { %4233 = vmatmul.mubr.f32.vlgmr.msra.gmra.mrb[0].mxu1 %v357_v30  ;;  %v5368_v30 = vand.u32 4294901760, %v784_v15  ;;  %v2981_v3 = vand.u32 4294901760, %v5432_v2  ;;  %v4629_v5 = vpack.c.bf16 %v5432_v2, %v5430_v0 }
  0x9e   : > { %4520 = vmatpush3.bf16.msra.mxu1 %v4517_v60  ;;  %4239 = vmatprep.mubr.f32.mxu1 %v5229_v1  ;;  %v2864_v60 = vld [vmem:[#allocation2 + $0xd] sm:$0xff]  ;;  %vm3392_vm7 = vcmp.ge.f32.partialorder %v3390_v43, 3.0  ;;  %vm3394_vm8 = vcmp.lt.f32.partialorder %v3390_v43, 19.0 }
  0x9f   : > { %4522 = vmatprep.subr.bf16.mxu1 %v5156_v19  ;;  %v5390_v49 = vsub.f32 %v784_v15, %v5368_v30  ;;  %v2982_v15 = vsub.f32 %v5432_v2, %v2981_v3  ;;  %vm5532_vm9 = vmand %vm3392_vm7, %vm3394_vm8  ;;  %v4637_v33 = vpack.c.bf16 %v2981_v3, %v2974_v31 }
  0xa0   : > { %4387 = vmatmul.mubr.f32.vlgmr.msra.gmra.mrb[0].mxu0 %v5293_v44 }
  0xa1   : > { %4608 = vmatpush3.bf16.msra.mxu0 %v4605_v18  ;;  %4393 = vmatprep.mubr.f32.mxu0 %v5285_v37  ;;  %v2983_v40 = vand.u32 4294901760, %v2982_v15 }
  0xa2   : > { %4610 = vmatprep.subr.bf16.mxu0 %v5298_v48 }
  0xa5   : > { %4240 = vmatmul.mubr.f32.vlgmr.msra.gmra.mrb[0].mxu1 %v5245_v10 }
  0xa6   : > { %4524 = vmatpush3.bf16.msra.mxu1 %v5156_v19  ;;  %4246 = vmatprep.mubr.f32.mxu1 %v5229_v1  ;;  %v2873_v19 = vsel %vm5392_vm12, %v2863_v32, 0.0  ;;  %v865_v1 = vand.u32 4294901760, %v5390_v49 }
  0xa7   : > { %4526 = vmatprep.subr.bf16.mxu1 %v5379_v39  ;;  %v2879_v45 = vsel %vm238_vm0, %v2873_v19, 0 }
  0xa8   : > { %4394 = vmatmul.mubr.f32.vlgmr.msra.gmra.mrb[0].mxu0 %v5308_v51  ;;  %v866_v62 = vsub.f32 %v5390_v49, %v865_v1  ;;  %v5426_v37 = vand.u32 4294901760, %v2879_v45 }
  0xa9   : > { %4612 = vmatpush3.bf16.msra.mxu0 %v5298_v48  ;;  %4400 = vmatprep.mubr.f32.mxu0 %v2428_v46  ;;  %v2874_v46 = vsel %vm5417_vm15, %v2864_v60, 0.0 }
  0xaa   : > { %4614 = vmatprep.subr.bf16.mxu0 %v4613_v56  ;;  %v5438_v18 = vsub.f32 %v2879_v45, %v5426_v37  ;;  %v2882_v23 = vsel %vm238_vm0, %v2874_v46, 0 }
  0xab   : > { %v5446_v51 = vand.u32 4294901760, %v2882_v23 }
  0xad   : > { %4247 = vmatmul.mubr.f32.vlgmr.msra.gmra.mrb[0].mxu1 %v5245_v10  ;;  %v867_v10 = vand.u32 4294901760, %v866_v62  ;;  %v5460_v20 = vsub.f32 %v2882_v23, %v5446_v51 }
  0xae   : > { %4528 = vmatpush3.bf16.msra.mxu1 %v5379_v39  ;;  %4253 = vmatprep.mubr.f32.mxu1 %v857_v25 }
  0xaf   : > { %4530 = vmatprep.subr.bf16.mxu1 %v4529_v59  ;;  %v2963_v42 = vand.u32 4294901760, %v5460_v20 }
  0xb0   : > { %4401 = vmatmul.mubr.f32.vlgmr.msra.gmra.mrb[0].mxu0 %v2438_v54  ;;  %v2953_v54 = vand.u32 4294901760, %v5438_v18 }
  0xb1   : > { %4616 = vmatpush3.bf16.msra.mxu0 %v4613_v56  ;;  %4407 = vmatprep.mubr.f32.mxu0 %v5262_v24  ;;  %v2964_v32 = vsub.f32 %v5460_v20, %v2963_v42  ;;  %v1298_v56 = vsel %vm5477_vm3, %v1288_v35, 0.0 }
  0xb2   : > { %4618 = vmatprep.subr.bf16.mxu0 %v5298_v48  ;;  %v2954_v38 = vsub.f32 %v5438_v18, %v2953_v54  ;;  %v1304_v21 = vsel %vm238_vm0, %v1298_v56, 0 }
  0xb3   : > { %v2965_v57 = vand.u32 4294901760, %v2964_v32  ;;  %v5497_v19 = vand.u32 4294901760, %v1304_v21 }
  0xb5   : > { %4254 = vmatmul.mubr.f32.vlgmr.msra.gmra.mrb[0].mxu1 %v867_v10  ;;  %v3388_v10 = vld [vmem:[#allocation2 + $0x6] sm:$0xff] }
  0xb6   : > { %4532 = vmatpush3.bf16.msra.mxu1 %v4529_v59  ;;  %4260 = vmatprep.mubr.f32.mxu1 %v5347_v4  ;;  %v5507_v59 = vsub.f32 %v1304_v21, %v5497_v19 }
  0xb7   : > { %4534 = vmatprep.subr.bf16.mxu1 %v4533_v29 }
  0xb8   : > { %4408 = vmatmul.mubr.f32.vlgmr.msra.gmra.mrb[0].mxu0 %v5293_v44 }
  0xb9   : > { %4620 = vmatpush3.bf16.msra.mxu0 %v5298_v48  ;;  %4414 = vmatprep.mubr.f32.mxu0 %v5262_v24  ;;  %v2955_v48 = vand.u32 4294901760, %v2954_v38  ;;  %v4625_v24 = vpack.c.bf16 %v2983_v40, %v2976_v41  ;;  %v3401_v41 = vld [vmem:[#allocation7 + $0x60] sm:$0xff]  ;;  %v3402_v40 = vld [vmem:[#allocation7 + $0x68] sm:$0xff] }
  0xba   : > { %4622 = vmatprep.subr.bf16.mxu0 %v5450_v9  ;;  %v3410_v2 = vand.u32 4294901760, %v3401_v41  ;;  %v3413_v31 = vand.u32 4294901760, %v3402_v40 }
  0xbc   : > { %v5568_v35 = vsub.f32 %v3401_v41, %v3410_v2  ;;  %v5570_v50 = vsub.f32 %v3402_v40, %v3413_v31 }
  0xbd   : > { %4261 = vmatmul.mubr.f32.vlgmr.msra.gmra.mrb[0].mxu1 %v5368_v30 }
  0xbe   : > { %4536 = vmatpush3.bf16.msra.mxu1 %v4533_v29  ;;  %4267 = vmatprep.mubr.f32.mxu1 %v5360_v12  ;;  %v5501_v12 = vsub.f32 %v1302_v55, %v1313_v28  ;;  %v3391_v29 = vadd.f32 6.0, %v5158_v22  ;;  %v3398_v22 = vsel %vm5532_vm9, %v3388_v10, 0.0  ;;  %v3499_v55 = vand.u32 4294901760, %v5568_v35 }
  0xbf   : > { %4538 = vmatprep.subr.bf16.mxu1 %v5379_v39  ;;  %v3404_v3 = vsel %vm238_vm0, %v3398_v22, 0  ;;  %v3506_v56 = vand.u32 4294901760, %v5570_v50 }
  0xc0   : > { %4415 = vmatmul.mubr.f32.vlgmr.msra.gmra.mrb[0].mxu0 %v5293_v44  ;;  %v1301_v44 = vld [vmem:[#allocation7 + $0x20] sm:$0xff]  ;;  %v1406_v60 = vand.u32 4294901760, %v5501_v12  ;;  %vm3393_vm10 = vcmp.ge.f32.partialorder %v3391_v29, 3.0  ;;  %vm3395_vm11 = vcmp.lt.f32.partialorder %v3391_v29, 19.0 }
  0xc1   : > { %4624 = vmatpush3.bf16.msra.mxu0 %v5450_v9  ;;  %4421 = vmatprep.mubr.f32.mxu0 %v2955_v48  ;;  %v1310_v6 = vand.u32 4294901760, %v1301_v44  ;;  %v3389_v48 = vld [vmem:[#allocation2 + $0xe] sm:$0xff]  ;;  %vm5555_vm12 = vmand %vm3393_vm10, %vm3395_vm11 }
  0xc2   : > { %4626 = vmatprep.subr.bf16.mxu0 %v4625_v24  ;;  %v1407_v62 = vsub.f32 %v5501_v12, %v1406_v60 }
  0xc3   : > { %v5499_v25 = vsub.f32 %v1301_v44, %v1310_v6  ;;  %v5519_v61 = vpack.c.bf16 %v1313_v28, %v1310_v6  ;;  %v3507_v6 = vsub.f32 %v5570_v50, %v3506_v56 }
  0xc4   : > { %v1408_v38 = vand.u32 4294901760, %v1407_v62 }
  0xc5   : > { %4268 = vmatmul.mubr.f32.vlgmr.msra.gmra.mrb[0].mxu1 %v5390_v49  ;;  %v1399_v45 = vand.u32 4294901760, %v5499_v25  ;;  %v4557_v44 = vpack.c.bf16 %v5501_v12, %v5499_v25  ;;  %v4661_v12 = vpack.c.bf16 %v3506_v56, %v3499_v55 }
  0xc6   : > { %4540 = vmatpush3.bf16.msra.mxu1 %v5379_v39  ;;  %4274 = vmatprep.mubr.f32.mxu1 %v855_v34  ;;  %v1299_v34 = vsel %vm1297_vm6, %v1289_v58, 0.0 }
  0xc7   : > { %4542 = vmatprep.subr.bf16.mxu1 %v4541_v53  ;;  %v1307_v26 = vsel %vm238_vm0, %v1299_v34, 0  ;;  %v1400_v13 = vsub.f32 %v5499_v25, %v1399_v45  ;;  %v3508_v34 = vand.u32 4294901760, %v3507_v6  ;;  %v1904_v25 = vsub.f32 %v5238_v7, %v1903_v16 }
  0xc8   : > { %4422 = vmatmul.mubr.f32.vlgmr.msra.gmra.mrb[0].mxu0 %v2965_v57  ;;  %v5515_v49 = vand.u32 4294901760, %v1307_v26  ;;  %v5585_v57 = vpack.c.bf16 %v3413_v31, %v3410_v2 }
  0xc9   : > { %4628 = vmatpush3.bf16.msra.mxu0 %v4625_v24  ;;  %4428 = vmatprep.mubr.f32.mxu0 %v5426_v37  ;;  %v1401_v15 = vand.u32 4294901760, %v1400_v13 }
  0xca   : > { %4630 = vmatprep.subr.bf16.mxu0 %v4629_v5  ;;  %v5530_v46 = vsub.f32 %v1307_v26, %v5515_v49 }
  0xcb   : > { %v4553_v0 = vpack.c.bf16 %v1408_v38, %v1401_v15 }
  0xcd   : > { %4275 = vmatmul.mubr.f32.vlgmr.msra.gmra.mrb[0].mxu1 %v865_v1  ;;  %v1378_v1 = vand.u32 4294901760, %v5507_v59 }
  0xce   : > { %4544 = vmatpush3.bf16.msra.mxu1 %v4541_v53  ;;  %4281 = vmatprep.mubr.f32.mxu1 %v5347_v4 }
  0xcf   : > { %4546 = vmatprep.subr.bf16.mxu1 %v5379_v39  ;;  %v1379_v11 = vsub.f32 %v5507_v59, %v1378_v1 }
  0xd0   : > { %4429 = vmatmul.mubr.f32.vlgmr.msra.gmra.mrb[0].mxu0 %v5446_v51 }
  0xd1   : > { %4632 = vmatpush3.bf16.msra.mxu0 %v4629_v5  ;;  %4435 = vmatprep.mubr.f32.mxu0 %v5438_v18  ;;  %v5564_v18 = vand.u32 4294901760, %v3404_v3  ;;  %v3500_v5 = vsub.f32 %v5568_v35, %v3499_v55 }
  0xd2   : > { %4634 = vmatprep.subr.bf16.mxu0 %v5450_v9 }
  0xd3   : > { %v3477_v52 = vsub.f32 %v3404_v3, %v5564_v18  ;;  %v3501_v58 = vand.u32 4294901760, %v3500_v5 }
  0xd5   : > { %4282 = vmatmul.mubr.f32.vlgmr.msra.gmra.mrb[0].mxu1 %v5368_v30  ;;  %v4649_v13 = vpack.c.bf16 %v3508_v34, %v3501_v58 }
  0xd6   : > { %4548 = vmatpush3.bf16.msra.mxu1 %v5379_v39  ;;  %4288 = vmatprep.mubr.f32.mxu1 %v5347_v4  ;;  %v1388_v4 = vand.u32 4294901760, %v5530_v46  ;;  %v1380_v39 = vand.u32 4294901760, %v1379_v11 }
  0xd7   : > { %4550 = vmatprep.subr.bf16.mxu1 %v5519_v61 }
  0xd8   : > { %4436 = vmatmul.mubr.f32.vlgmr.msra.gmra.mrb[0].mxu0 %v5460_v20  ;;  %v1389_v32 = vsub.f32 %v5530_v46, %v1388_v4 }
  0xd9   : > { %4636 = vmatpush3.bf16.msra.mxu0 %v5450_v9  ;;  %4442 = vmatprep.mubr.f32.mxu0 %v2953_v54  ;;  %v3399_v54 = vsel %vm5555_vm12, %v3389_v48, 0.0 }
  0xda   : > { %4638 = vmatprep.subr.bf16.mxu0 %v4637_v33  ;;  %v3407_v53 = vsel %vm238_vm0, %v3399_v54, 0 }
  0xdb   : > { %v5582_v20 = vand.u32 4294901760, %v3407_v53 }
  0xdd   : > { %4289 = vmatmul.mubr.f32.vlgmr.msra.gmra.mrb[0].mxu1 %v5368_v30  ;;  %v1390_v30 = vand.u32 4294901760, %v1389_v32  ;;  %v3487_v28 = vsub.f32 %v3407_v53, %v5582_v20 }
  0xde   : > { %4552 = vmatpush3.bf16.msra.mxu1 %v5519_v61  ;;  %4295 = vmatprep.mubr.f32.mxu1 %v1380_v39 }
  0xdf   : > { %4554 = vmatprep.subr.bf16.mxu1 %v4553_v0  ;;  %v3488_v26 = vand.u32 4294901760, %v3487_v28 }
  0xe0   : > { %4443 = vmatmul.mubr.f32.vlgmr.msra.gmra.mrb[0].mxu0 %v2963_v42  ;;  %v3478_v42 = vand.u32 4294901760, %v3477_v52 }
  0xe1   : > { %4640 = vmatpush3.bf16.msra.mxu0 %v4637_v33  ;;  %4449 = vmatprep.mubr.f32.mxu0 %v5426_v37 }
  0xe2   : > { %4642 = vmatprep.subr.bf16.mxu0 %v5450_v9  ;;  %v3479_v21 = vsub.f32 %v3477_v52, %v3478_v42 }
  0xe4   : > { %v3480_v43 = vand.u32 4294901760, %v3479_v21 }
  0xe5   : > { %4296 = vmatmul.mubr.f32.vlgmr.msra.gmra.mrb[0].mxu1 %v1390_v30 }
  0xe6   : > { %4556 = vmatpush3.bf16.msra.mxu1 %v4553_v0  ;;  %4302 = vmatprep.mubr.f32.mxu1 %v5497_v19 }
  0xe7   : > { %4558 = vmatprep.subr.bf16.mxu1 %v4557_v44 }
  0xe8   : > { %4450 = vmatmul.mubr.f32.vlgmr.msra.gmra.mrb[0].mxu0 %v5446_v51 }
  0xe9   : > { %4644 = vmatpush3.bf16.msra.mxu0 %v5450_v9  ;;  %4456 = vmatprep.mubr.f32.mxu0 %v5426_v37  ;;  %v3489_v9 = vsub.f32 %v3487_v28, %v3488_v26  ;;  %v4565_v37 = vpack.c.bf16 %v1406_v60, %v1399_v45  ;;  %v1914_v45 = vsub.f32 %v5256_v17, %v1913_v27 }
  0xea   : > { %4646 = vmatprep.subr.bf16.mxu0 %v5585_v57 }
  0xeb   : > { %v3490_v62 = vand.u32 4294901760, %v3489_v9  ;;  %v1915_v16 = vand.u32 4294901760, %v1914_v45 }
  0xed   : > { %4303 = vmatmul.mubr.f32.vlgmr.msra.gmra.mrb[0].mxu1 %v5515_v49 }
  0xee   : > { %4560 = vmatpush3.bf16.msra.mxu1 %v4557_v44  ;;  %4309 = vmatprep.mubr.f32.mxu1 %v5507_v59  ;;  %v1905_v59 = vand.u32 4294901760, %v1904_v25 }
  0xef   : > { %4562 = vmatprep.subr.bf16.mxu1 %v5519_v61 }
  0xf0   : > { %4457 = vmatmul.mubr.f32.vlgmr.msra.gmra.mrb[0].mxu0 %v5446_v51  ;;  %v4653_v51 = vpack.c.bf16 %v5570_v50, %v5568_v35 }
  0xf1   : > { %4648 = vmatpush3.bf16.msra.mxu0 %v5585_v57  ;;  %4463 = vmatprep.mubr.f32.mxu0 %v3480_v43 }
  0xf2   : > { %4650 = vmatprep.subr.bf16.mxu0 %v4649_v13 }
  0xf5   : > { %4310 = vmatmul.mubr.f32.vlgmr.msra.gmra.mrb[0].mxu1 %v5530_v46 }
  0xf6   : > { %4564 = vmatpush3.bf16.msra.mxu1 %v5519_v61  ;;  %4316 = vmatprep.mubr.f32.mxu1 %v1378_v1 }
  0xf7   : > { %4566 = vmatprep.subr.bf16.mxu1 %v4565_v37 }
  0xf8   : > { %4464 = vmatmul.mubr.f32.vlgmr.msra.gmra.mrb[0].mxu0 %v3490_v62 }
  0xf9   : > { %4652 = vmatpush3.bf16.msra.mxu0 %v4649_v13  ;;  %4470 = vmatprep.mubr.f32.mxu0 %v5564_v18 }
  0xfa   : > { %4654 = vmatprep.subr.bf16.mxu0 %v4653_v51 }
  0xfd   : > { %4317 = vmatmul.mubr.f32.vlgmr.msra.gmra.mrb[0].mxu1 %v1388_v4 }
  0xfe   : > { %4568 = vmatpush3.bf16.msra.mxu1 %v4565_v37  ;;  %4323 = vmatprep.mubr.f32.mxu1 %v5497_v19 }
  0xff   : > { %4570 = vmatprep.subr.bf16.mxu1 %v5519_v61 }
 0x100   : > { %4471 = vmatmul.mubr.f32.vlgmr.msra.gmra.mrb[0].mxu0 %v5582_v20 }
 0x101   : > { %4656 = vmatpush3.bf16.msra.mxu0 %v4653_v51  ;;  %4477 = vmatprep.mubr.f32.mxu0 %v3477_v52 }
 0x102   : > { %4658 = vmatprep.subr.bf16.mxu0 %v5585_v57 }
 0x105   : > { %4324 = vmatmul.mubr.f32.vlgmr.msra.gmra.mrb[0].mxu1 %v5515_v49 }
 0x106   : > { %4572 = vmatpush3.bf16.msra.mxu1 %v5519_v61  ;;  %4330 = vmatprep.mubr.f32.mxu1 %v5497_v19 }
 0x107   : > { %4574 = vmatprep.subr.bf16.mxu1 %v5149_v14 }
 0x108   : > { %4478 = vmatmul.mubr.f32.vlgmr.msra.gmra.mrb[0].mxu0 %v3487_v28 }
 0x109   : > { %4660 = vmatpush3.bf16.msra.mxu0 %v5585_v57  ;;  %4484 = vmatprep.mubr.f32.mxu0 %v3478_v42 }
 0x10a   : > { %4662 = vmatprep.subr.bf16.mxu0 %v4661_v12 }
 0x10d   : > { %4331 = vmatmul.mubr.f32.vlgmr.msra.gmra.mrb[0].mxu1 %v5515_v49 }
 0x10e   : > { %4576 = vmatpush3.bf16.msra.mxu1 %v5149_v14  ;;  %4337 = vmatprep.mubr.f32.mxu1 %v1905_v59 }
 0x10f   : > { %4578 = vmatprep.subr.bf16.mxu1 %v5397_v47 }
 0x110   : > { %4485 = vmatmul.mubr.f32.vlgmr.msra.gmra.mrb[0].mxu0 %v3488_v26 }
 0x111   : > { %4664 = vmatpush3.bf16.msra.mxu0 %v4661_v12  ;;  %4491 = vmatprep.mubr.f32.mxu0 %v5564_v18 }
 0x112   : > { %4666 = vmatprep.subr.bf16.mxu0 %v5585_v57 }
 0x115   : > { %4338 = vmatmul.mubr.f32.vlgmr.msra.gmra.mrb[0].mxu1 %v1915_v16 }
 0x116   : > { %4580 = vmatpush3.bf16.msra.mxu1 %v5397_v47  ;;  %4344 = vmatprep.mubr.f32.mxu1 %v5225_v63 }
 0x117   : > { %4582 = vmatprep.subr.bf16.mxu1 %v5377_v36 }
 0x118   : > { %4492 = vmatmul.mubr.f32.vlgmr.msra.gmra.mrb[0].mxu0 %v5582_v20 }
 0x119   : > { %4668 = vmatpush3.bf16.msra.mxu0 %v5585_v57  ;;  %4498 = vmatprep.mubr.f32.mxu0 %v5564_v18 }
 0x11d   : > { %4345 = vmatmul.mubr.f32.vlgmr.msra.gmra.mrb[0].mxu1 %v5240_v8 }
 0x11e   : > { %4584 = vmatpush3.bf16.msra.mxu1 %v5377_v36  ;;  %4351 = vmatprep.mubr.f32.mxu1 %v5238_v7 }
 0x120   : > { %4499 = vmatmul.mubr.f32.vlgmr.msra.gmra.mrb[0].mxu0 %v5582_v20 }
 0x125   : > { %4352 = vmatmul.mubr.f32.vlgmr.msra.gmra.mrb[0].mxu1 %v5256_v17 }
 0x1f3   : > { %v4500_v14 = vpop.f32.mrb[0].mxu0 }
 0x1f4   : > { %v3901_v63 = vpop.f32.mrb[1].mxu0 }
 0x1f8   : > { %v4353_v27 = vpop.f32.mrb[0].mxu1 }
 0x1f9   : > { %v4669_v47 = vadd.f32 %v4500_v14, %v4353_v27  ;;  %v2080_v19 = vpop.f32.mrb[1].mxu1 }
 0x1fa   : > { %v4670_v60 = vadd.f32 %v3901_v63, %v2080_v19 }
 0x1fb   : > { %v4035_v49 = vmul.f32 -1.442695, %v4669_v47 }
 0x1fc   : > { %v4034_v1 = vmul.f32 -1.442695, %v4670_v60 }
 0x1fd   : > { %4813 = vpow2.f32 %v4035_v49 }
 0x1fe   : > { %4815 = vpow2.f32 %v4034_v1 }
 0x207   : > { %v4814_v8 = vpop.eup %4813 }
 0x208   : > { %v4816_v36 = vpop.eup %4815  ;;  %v3920_v61 = vadd.f32 1.0, %v4814_v8 }
 0x209   : > { %v3919_v7 = vadd.f32 1.0, %v4816_v36 }
 0x20b   : > { %4817 = vrcp.f32 %v3919_v7 }
 0x20c   : > { %4819 = vrcp.f32 %v3920_v61 }
 0x215   : > { %v4818_v17 = vpop.eup %4817 }
 0x216   : > { %v4820_v46 = vpop.eup %4819  ;;  %3925 = vst.msk [vmem:[%s219_s7] sm:$0xff] %vm238_vm0, %v4818_v17 }
 0x217   : > { %3926 = vst.msk [vmem:[%s219_s7 + $0x8] sm:$0xff] %vm238_vm0, %v4820_v46 }
 0x218 PF: > { %p14_p6 = scmp.ge.s32.totalorder %s5074_s29, 4   ;;  %s5703_s12 = smov %s4937_s13 }
 0x219   : > { %s5704_s13 = smov %s4941_s14  ;;  %s5705_s14 = smov %s5085_s5 }
 0x21a   : > { %s5706_s15 = smov %s5074_s29  ;;  %16 = sbr.rel (!%p14_p6) target bundleno = 4 (0x4), region = 89 }
 0x221   :  { %3949 = vsyncpa [#allocation4], 1 }
 0x222   :  { %3951 = vsyncpa [#allocation4 + $0x1], 1 }
 0x223   :  { %3952 = vsyncpa [#allocation6], 1 }

</bundles_post_ra>
